<compile_context>
chip_gen: v6e
topology: v6e:2x2x1
jax: 0.10.0
libtpu: 0.0.40
codegen_flags: <defaults>
</compile_context>

<pallas_src>
import functools

import jax
import jax.numpy as jnp
from jax.experimental import pallas as pl
from jax.experimental.pallas import tpu as pltpu


def neumf_kernel(feat_ref,                       # (80, TB) bf16, batch on lanes
                 w1_ref, b1_ref,                 # (32, 80), (32, 1)
                 w2_ref, b2_ref,                 # (16, 32), (16, 1)
                 w3_ref, b3_ref,                 # (8, 16),  (8, 1)
                 wlg_ref, wlm_ref, bl_ref,       # (1, 8), (1, 8), (1, 1)
                 out_ref):                       # (1, TB) f32
    # Single upcast of the packed stream (v5e VPU has no bf16; cast is cheap).
    f = feat_ref[...].astype(jnp.float32)        # (80, TB)
    # Row layout: 0:8 gmf_u | 8:40 mlp_u | 40:48 gmf_i | 48:80 mlp_i.

    # MLP branch — concat folded into the zero-padded layer-1 weight.
    x = jnp.maximum(
        jnp.dot(w1_ref[...], f, preferred_element_type=jnp.float32)
        + b1_ref[...], 0.0)                      # (32, TB)
    x = jnp.maximum(
        jnp.dot(w2_ref[...], x, preferred_element_type=jnp.float32)
        + b2_ref[...], 0.0)                      # (16, TB)
    x = jnp.maximum(
        jnp.dot(w3_ref[...], x, preferred_element_type=jnp.float32)
        + b3_ref[...], 0.0)                      # (8, TB)

    # GMF branch — sublane-aligned (multiples of 8) slices, no relayout.
    prod = f[0:8, :] * f[40:48, :]               # (8, TB)

    # Fused logit, already lane-dense (batch on lanes) -> no transpose needed.
    logits = (jnp.dot(wlg_ref[...], prod, preferred_element_type=jnp.float32)
              + jnp.dot(wlm_ref[...], x, preferred_element_type=jnp.float32)
              + bl_ref[...])                     # (1, TB)
    out_ref[...] = jax.nn.sigmoid(logits)


def init_neumf_params(key, num_users, num_items, num_factors=8,
                      layers=(64, 32, 16, 8)):
    """f32 parameters matching the PyTorch NeuMF _init_weight scheme."""
    assert layers[-1] == num_factors
    keys = jax.random.split(key, 16)
    ki = iter(keys)
    p = {}
    # Embeddings: normal(std=0.01).
    p["gmf_user_emb"] = 0.01 * jax.random.normal(next(ki), (num_users, num_factors), jnp.float32)
    p["gmf_item_emb"] = 0.01 * jax.random.normal(next(ki), (num_items, num_factors), jnp.float32)
    p["mlp_user_emb"] = 0.01 * jax.random.normal(next(ki), (num_users, layers[0] // 2), jnp.float32)
    p["mlp_item_emb"] = 0.01 * jax.random.normal(next(ki), (num_items, layers[0] // 2), jnp.float32)
    # MLP Linear layers: xavier-uniform weights, small biases.
    # Stored pre-transposed as (in, out); bias as (1, out).
    for idx in range(len(layers) - 1):
        fan_in, fan_out = layers[idx], layers[idx + 1]
        bound = (6.0 / (fan_in + fan_out)) ** 0.5
        p[f"w{idx + 1}"] = jax.random.uniform(
            next(ki), (fan_in, fan_out), jnp.float32, -bound, bound)
        p[f"b{idx + 1}"] = 0.01 * jax.random.normal(next(ki), (1, fan_out), jnp.float32)
    # Fused logit: Linear(num_factors + layers[-1], 1), normal(std=0.01).
    in_dim = num_factors + layers[-1]
    p["wl"] = 0.01 * jax.random.normal(next(ki), (in_dim, 1), jnp.float32)
    p["bl"] = 0.01 * jax.random.normal(next(ki), (1, 1), jnp.float32)
    return p


def prepare_neumf_inference(params):
    """One-time prep: fuse/bf16 the embedding tables, transpose + zero-pad
    the dense weights so the kernel never concatenates or transposes."""
    F = params["gmf_user_emb"].shape[1]          # 8
    Lh = params["mlp_user_emb"].shape[1]         # 32

    user_table = jnp.concatenate(
        [params["gmf_user_emb"], params["mlp_user_emb"]], axis=1).astype(jnp.bfloat16)
    item_table = jnp.concatenate(
        [params["gmf_item_emb"], params["mlp_item_emb"]], axis=1).astype(jnp.bfloat16)

    w1, b1 = params["w1"], params["b1"]          # (64,32), (1,32)
    w2, b2 = params["w2"], params["b2"]          # (32,16), (1,16)
    w3, b3 = params["w3"], params["b3"]          # (16, 8), (1, 8)
    wl, bl = params["wl"], params["bl"]          # (16, 1), (1, 1)

    # Layer-1 weight, transposed and zero-padded over the GMF rows of the
    # packed stream:  relu(w1T_p @ featT + b1T) == relu(w1.T @ concat(mu,mi)).
    w1T = w1.T                                                   # (32, 64)
    zg = jnp.zeros((w1.shape[1], F), w1.dtype)                   # (32, 8)
    w1T_p = jnp.concatenate([zg, w1T[:, :Lh], zg, w1T[:, Lh:]], axis=1)  # (32, 80)

    return dict(
        user_table=user_table, item_table=item_table,
        w1=w1T_p, b1=b1.T,
        w2=w2.T, b2=b2.T,
        w3=w3.T, b3=b3.T,
        wlg=wl[:F, 0].reshape(1, F),             # (1, 8) — picks GMF product
        wlm=wl[F:, 0].reshape(1, -1),            # (1, 8) — picks MLP output
        bl=bl,                                   # (1, 1)
    )


@functools.partial(jax.jit, static_argnames=("tile_b",))
def neumf_forward(prep, users, items, gmf_users=None, tile_b=8192):
    B = users.shape[0]
    # Batch tile: multiple of 128, capped to the (128-rounded) batch.
    tile = max(128, (int(tile_b) // 128) * 128)
    tile = min(tile, ((B + 127) // 128) * 128)
    Bp = ((B + tile - 1) // tile) * tile
    pad = Bp - B

    F = prep["wlg"].shape[1]                     # 8
    Dfeat = 2 * prep["user_table"].shape[1]      # 80

    # Pad *indices* (valid index 0) so gathered features come out padded.
    users_p = jnp.pad(users, (0, pad))
    items_p = jnp.pad(items, (0, pad))

    u_rows = prep["user_table"][users_p]         # (Bp, 40) bf16
    if gmf_users is not None:
        g_rows = prep["user_table"][jnp.pad(gmf_users, (0, pad))]
        u_rows = jnp.concatenate([g_rows[:, :F], u_rows[:, F:]], axis=-1)
    i_rows = prep["item_table"][items_p]         # (Bp, 40) bf16

    # Packed, TRANSPOSED feature stream: features on sublanes (80, no pad),
    # batch on lanes (multiple of 128, no pad) -> minimal HBM bytes.
    featT = jnp.concatenate([u_rows, i_rows], axis=-1).T   # (80, Bp) bf16

    num_tiles = Bp // tile
    feat_spec = pl.BlockSpec((Dfeat, tile), lambda i: (0, i))
    whole = lambda a: pl.BlockSpec(a.shape, lambda i: (0, 0))

    # VMEM budget from the actual footprint (double-buffered bf16 input block
    # + f32 working set + weights), well under v7x's 64 MiB.
    vmem_limit = max(16 * 1024 * 1024,
                     min(48 * 1024 * 1024, 4 * 1024 * 1024 + 2048 * tile))

    out = pl.pallas_call(
        neumf_kernel,
        out_shape=jax.ShapeDtypeStruct((1, Bp), jnp.float32),
        grid=(num_tiles,),
        in_specs=[
            feat_spec,
            whole(prep["w1"]), whole(prep["b1"]),
            whole(prep["w2"]), whole(prep["b2"]),
            whole(prep["w3"]), whole(prep["b3"]),
            whole(prep["wlg"]), whole(prep["wlm"]), whole(prep["bl"]),
        ],
        out_specs=pl.BlockSpec((1, tile), lambda i: (0, i)),
        compiler_params=pltpu.CompilerParams(
            dimension_semantics=("parallel",),
            vmem_limit_bytes=vmem_limit),
    )(featT, prep["w1"], prep["b1"], prep["w2"], prep["b2"],
      prep["w3"], prep["b3"], prep["wlg"], prep["wlm"], prep["bl"])

    return out[0, :B]   # matches PyTorch .view(-1)


def neumf_reference(params, users, items, gmf_users=None):
    """Pure-JAX f32 reference for correctness checking."""
    gusers = users if gmf_users is None else gmf_users
    h_gmf = params["gmf_user_emb"][gusers] * params["gmf_item_emb"][items]
    x = jnp.concatenate(
        [params["mlp_user_emb"][users], params["mlp_item_emb"][items]], axis=-1)
    x = jax.nn.relu(x @ params["w1"] + params["b1"])
    x = jax.nn.relu(x @ params["w2"] + params["b2"])
    x = jax.nn.relu(x @ params["w3"] + params["b3"])
    h = jnp.concatenate([h_gmf, x], axis=-1)
    return jax.nn.sigmoid(h @ params["wl"] + params["bl"])[:, 0]


if __name__ == "__main__":
    key = jax.random.PRNGKey(0)
    num_users, num_items = 100, 200
    num_factors, layers = 8, (64, 32, 16, 8)
    batch = 6

    pkey, ukey, ikey = jax.random.split(key, 3)
    params = init_neumf_params(pkey, num_users, num_items, num_factors, layers)
    users = jax.random.randint(ukey, (batch,), 0, num_users, dtype=jnp.int32)
    items = jax.random.randint(ikey, (batch,), 0, num_items, dtype=jnp.int32)

    prep = prepare_neumf_inference(params)
    out = neumf_forward(prep, users, items)
    out = jax.block_until_ready(out)

    ref = neumf_reference(params, users, items)
    assert out.shape == (batch,), out.shape
    # bf16 embedding tables -> relaxed tolerance (kernel accumulates in f32).
    assert jnp.allclose(out, ref, atol=2e-3, rtol=2e-3), (out, ref)

    print("KERNEL_OK")
</pallas_src>

<mosaic_0001>
module attributes {stable_mosaic.version = 11 : i64} {
  func.func @neumf_kernel(%arg0: i32, %arg1: memref<80x128xbf16, #tpu.memory_space<vmem>>, %arg2: memref<32x80xf32, #tpu.memory_space<vmem>>, %arg3: memref<32x1xf32, #tpu.memory_space<vmem>>, %arg4: memref<16x32xf32, #tpu.memory_space<vmem>>, %arg5: memref<16x1xf32, #tpu.memory_space<vmem>>, %arg6: memref<8x16xf32, #tpu.memory_space<vmem>>, %arg7: memref<8x1xf32, #tpu.memory_space<vmem>>, %arg8: memref<1x8xf32, #tpu.memory_space<vmem>>, %arg9: memref<1x8xf32, #tpu.memory_space<vmem>>, %arg10: memref<1x1xf32, #tpu.memory_space<vmem>>, %arg11: memref<1x128xf32, #tpu.memory_space<vmem>>) attributes {dimension_semantics = [#tpu.dimension_semantics<parallel>], iteration_bounds = array<i64: 1>, scalar_prefetch = 0 : i64, scratch_operands = 0 : i64, tpu.core_type = #tpu.core_type<tc>, window_params = [{transform_indices = @transform_0, window_bounds = array<i64: 80, 128>}, {pipeline_mode = #tpu.pipeline_mode<synchronous>, transform_indices = @transform_1, window_bounds = array<i64: 32, 80>}, {pipeline_mode = #tpu.pipeline_mode<synchronous>, transform_indices = @transform_2, window_bounds = array<i64: 32, 1>}, {pipeline_mode = #tpu.pipeline_mode<synchronous>, transform_indices = @transform_3, window_bounds = array<i64: 16, 32>}, {pipeline_mode = #tpu.pipeline_mode<synchronous>, transform_indices = @transform_4, window_bounds = array<i64: 16, 1>}, {pipeline_mode = #tpu.pipeline_mode<synchronous>, transform_indices = @transform_5, window_bounds = array<i64: 8, 16>}, {pipeline_mode = #tpu.pipeline_mode<synchronous>, transform_indices = @transform_6, window_bounds = array<i64: 8, 1>}, {pipeline_mode = #tpu.pipeline_mode<synchronous>, transform_indices = @transform_7, window_bounds = array<i64: 1, 8>}, {pipeline_mode = #tpu.pipeline_mode<synchronous>, transform_indices = @transform_8, window_bounds = array<i64: 1, 8>}, {pipeline_mode = #tpu.pipeline_mode<synchronous>, transform_indices = @transform_9, window_bounds = array<i64: 1, 1>}, {transform_indices = @transform_10, window_bounds = array<i64: 1, 128>}]} {
    %c0 = arith.constant 0 : index
    %c0_0 = arith.constant 0 : index
    %0 = vector.load %arg1[%c0, %c0_0] : memref<80x128xbf16, #tpu.memory_space<vmem>>, vector<80x128xbf16>
    %1 = arith.extf %0 : vector<80x128xbf16> to vector<80x128xf32>
    %c0_1 = arith.constant 0 : index
    %c0_2 = arith.constant 0 : index
    %2 = vector.load %arg2[%c0_1, %c0_2] : memref<32x80xf32, #tpu.memory_space<vmem>>, vector<32x80xf32>
    %cst = arith.constant dense<0.000000e+00> : vector<32x128xf32>
    %3 = tpu.matmul %2, %1, %cst {dimension_numbers = #tpu.dot_dimension_numbers<[1], [0], [0], [1], [0, 0, 1, 1], [], []>} : vector<32x80xf32>, vector<80x128xf32>, vector<32x128xf32> -> vector<32x128xf32>
    %c0_3 = arith.constant 0 : index
    %c0_4 = arith.constant 0 : index
    %4 = vector.load %arg3[%c0_3, %c0_4] : memref<32x1xf32, #tpu.memory_space<vmem>>, vector<32x1xf32>
    %5 = vector.broadcast %4 : vector<32x1xf32> to vector<32x128xf32>
    %6 = arith.addf %3, %5 : vector<32x128xf32>
    %cst_5 = arith.constant 0.000000e+00 : f32
    %7 = vector.broadcast %cst_5 : f32 to vector<32x128xf32>
    %8 = arith.maximumf %6, %7 : vector<32x128xf32>
    %c0_6 = arith.constant 0 : index
    %c0_7 = arith.constant 0 : index
    %9 = vector.load %arg4[%c0_6, %c0_7] : memref<16x32xf32, #tpu.memory_space<vmem>>, vector<16x32xf32>
    %cst_8 = arith.constant dense<0.000000e+00> : vector<16x128xf32>
    %10 = tpu.matmul %9, %8, %cst_8 {dimension_numbers = #tpu.dot_dimension_numbers<[1], [0], [0], [1], [0, 0, 1, 1], [], []>} : vector<16x32xf32>, vector<32x128xf32>, vector<16x128xf32> -> vector<16x128xf32>
    %c0_9 = arith.constant 0 : index
    %c0_10 = arith.constant 0 : index
    %11 = vector.load %arg5[%c0_9, %c0_10] : memref<16x1xf32, #tpu.memory_space<vmem>>, vector<16x1xf32>
    %12 = vector.broadcast %11 : vector<16x1xf32> to vector<16x128xf32>
    %13 = arith.addf %10, %12 : vector<16x128xf32>
    %cst_11 = arith.constant 0.000000e+00 : f32
    %14 = vector.broadcast %cst_11 : f32 to vector<16x128xf32>
    %15 = arith.maximumf %13, %14 : vector<16x128xf32>
    %c0_12 = arith.constant 0 : index
    %c0_13 = arith.constant 0 : index
    %16 = vector.load %arg6[%c0_12, %c0_13] : memref<8x16xf32, #tpu.memory_space<vmem>>, vector<8x16xf32>
    %cst_14 = arith.constant dense<0.000000e+00> : vector<8x128xf32>
    %17 = tpu.matmul %16, %15, %cst_14 {dimension_numbers = #tpu.dot_dimension_numbers<[1], [0], [0], [1], [0, 0, 1, 1], [], []>} : vector<8x16xf32>, vector<16x128xf32>, vector<8x128xf32> -> vector<8x128xf32>
    %c0_15 = arith.constant 0 : index
    %c0_16 = arith.constant 0 : index
    %18 = vector.load %arg7[%c0_15, %c0_16] : memref<8x1xf32, #tpu.memory_space<vmem>>, vector<8x1xf32>
    %19 = vector.broadcast %18 : vector<8x1xf32> to vector<8x128xf32>
    %20 = arith.addf %17, %19 : vector<8x128xf32>
    %cst_17 = arith.constant 0.000000e+00 : f32
    %21 = vector.broadcast %cst_17 : f32 to vector<8x128xf32>
    %22 = arith.maximumf %20, %21 : vector<8x128xf32>
    %23 = vector.extract_strided_slice %1 {offsets = [0, 0], sizes = [8, 128], strides = [1, 1]} : vector<80x128xf32> to vector<8x128xf32>
    %24 = vector.extract_strided_slice %1 {offsets = [40, 0], sizes = [8, 128], strides = [1, 1]} : vector<80x128xf32> to vector<8x128xf32>
    %25 = arith.mulf %23, %24 : vector<8x128xf32>
    %c0_18 = arith.constant 0 : index
    %c0_19 = arith.constant 0 : index
    %26 = vector.load %arg8[%c0_18, %c0_19] : memref<1x8xf32, #tpu.memory_space<vmem>>, vector<1x8xf32>
    %cst_20 = arith.constant dense<0.000000e+00> : vector<1x128xf32>
    %27 = tpu.matmul %26, %25, %cst_20 {dimension_numbers = #tpu.dot_dimension_numbers<[1], [0], [0], [1], [0, 0, 1, 1], [], []>} : vector<1x8xf32>, vector<8x128xf32>, vector<1x128xf32> -> vector<1x128xf32>
    %c0_21 = arith.constant 0 : index
    %c0_22 = arith.constant 0 : index
    %28 = vector.load %arg9[%c0_21, %c0_22] : memref<1x8xf32, #tpu.memory_space<vmem>>, vector<1x8xf32>
    %cst_23 = arith.constant dense<0.000000e+00> : vector<1x128xf32>
    %29 = tpu.matmul %28, %22, %cst_23 {dimension_numbers = #tpu.dot_dimension_numbers<[1], [0], [0], [1], [0, 0, 1, 1], [], []>} : vector<1x8xf32>, vector<8x128xf32>, vector<1x128xf32> -> vector<1x128xf32>
    %30 = arith.addf %27, %29 : vector<1x128xf32>
    %c0_24 = arith.constant 0 : index
    %c0_25 = arith.constant 0 : index
    %31 = vector.load %arg10[%c0_24, %c0_25] : memref<1x1xf32, #tpu.memory_space<vmem>>, vector<1x1xf32>
    %32 = vector.broadcast %31 : vector<1x1xf32> to vector<1x128xf32>
    %33 = arith.addf %30, %32 : vector<1x128xf32>
    %34 = arith.negf %33 : vector<1x128xf32>
    %35 = math.exp %34 : vector<1x128xf32>
    %cst_26 = arith.constant 1.000000e+00 : f32
    %36 = vector.broadcast %cst_26 : f32 to vector<1x128xf32>
    %37 = arith.addf %36, %35 : vector<1x128xf32>
    %38 = arith.divf %36, %37 : vector<1x128xf32>
    %c0_27 = arith.constant 0 : index
    %c0_28 = arith.constant 0 : index
    %39 = vector.load %arg11[%c0_27, %c0_28] : memref<1x128xf32, #tpu.memory_space<vmem>>, vector<1x128xf32>
    tpu.vector_store %arg11[%c0_27, %c0_28], %38 {strides = array<i32>} : memref<1x128xf32, #tpu.memory_space<vmem>>, vector<1x128xf32>,
    return
  }
  func.func @transform_0(%arg0: i32) -> (i32, i32) {
    %c0_i32 = arith.constant 0 : i32
    %c0_i32_0 = arith.constant 0 : i32
    return %c0_i32, %arg0 : i32, i32
  }
  func.func @transform_1(%arg0: i32) -> (i32, i32) {
    %c0_i32 = arith.constant 0 : i32
    %c0_i32_0 = arith.constant 0 : i32
    %c0_i32_1 = arith.constant 0 : i32
    return %c0_i32, %c0_i32_0 : i32, i32
  }
  func.func @transform_2(%arg0: i32) -> (i32, i32) {
    %c0_i32 = arith.constant 0 : i32
    %c0_i32_0 = arith.constant 0 : i32
    %c0_i32_1 = arith.constant 0 : i32
    return %c0_i32, %c0_i32_0 : i32, i32
  }
  func.func @transform_3(%arg0: i32) -> (i32, i32) {
    %c0_i32 = arith.constant 0 : i32
    %c0_i32_0 = arith.constant 0 : i32
    %c0_i32_1 = arith.constant 0 : i32
    return %c0_i32, %c0_i32_0 : i32, i32
  }
  func.func @transform_4(%arg0: i32) -> (i32, i32) {
    %c0_i32 = arith.constant 0 : i32
    %c0_i32_0 = arith.constant 0 : i32
    %c0_i32_1 = arith.constant 0 : i32
    return %c0_i32, %c0_i32_0 : i32, i32
  }
  func.func @transform_5(%arg0: i32) -> (i32, i32) {
    %c0_i32 = arith.constant 0 : i32
    %c0_i32_0 = arith.constant 0 : i32
    %c0_i32_1 = arith.constant 0 : i32
    return %c0_i32, %c0_i32_0 : i32, i32
  }
  func.func @transform_6(%arg0: i32) -> (i32, i32) {
    %c0_i32 = arith.constant 0 : i32
    %c0_i32_0 = arith.constant 0 : i32
    %c0_i32_1 = arith.constant 0 : i32
    return %c0_i32, %c0_i32_0 : i32, i32
  }
  func.func @transform_7(%arg0: i32) -> (i32, i32) {
    %c0_i32 = arith.constant 0 : i32
    %c0_i32_0 = arith.constant 0 : i32
    %c0_i32_1 = arith.constant 0 : i32
    return %c0_i32, %c0_i32_0 : i32, i32
  }
  func.func @transform_8(%arg0: i32) -> (i32, i32) {
    %c0_i32 = arith.constant 0 : i32
    %c0_i32_0 = arith.constant 0 : i32
    %c0_i32_1 = arith.constant 0 : i32
    return %c0_i32, %c0_i32_0 : i32, i32
  }
  func.func @transform_9(%arg0: i32) -> (i32, i32) {
    %c0_i32 = arith.constant 0 : i32
    %c0_i32_0 = arith.constant 0 : i32
    %c0_i32_1 = arith.constant 0 : i32
    return %c0_i32, %c0_i32_0 : i32, i32
  }
  func.func @transform_10(%arg0: i32) -> (i32, i32) {
    %c0_i32 = arith.constant 0 : i32
    %c0_i32_0 = arith.constant 0 : i32
    return %c0_i32, %arg0 : i32, i32
  }
}

</mosaic_0001>

<bundles_post_ra>
// kernel: neumf_forward.1
= control target key start
LH: loop header
LB: loop body
LE: loop exit
PB: predicated region body
PF: predicated region fallthrough
CT: control target
= control target key end

     0   :  { %vm85_vm0 = vcmask 654336   ;;  %v663_v2 = vmov 0   ;;  %vm201_vm1 = vcmask 261120   ;;  %v664_v47 = vmov 0.0   ;;  %s809_s0 = inlined_call_operand.vmem [shape: bf16[80,128], index: 0, kind: input, shape index: {}]   ;;  %s810_s1 = inlined_call_operand.vmem [shape: f32[32,80], index: 1, kind: input, shape index: {}]   ;;  %s811_s9 = inlined_call_operand.<no memory space> [shape: f32[1,1], index: 9, kind: input, shape index: {}]   ;;  %s812_s2 = inlined_call_operand.vmem [shape: f32[32,1], index: 2, kind: input, shape index: {}]   ;;  %s813_s4 = inlined_call_operand.vmem [shape: f32[16,1], index: 4, kind: input, shape index: {}]   ;;  %s814_s6 = inlined_call_operand.vmem [shape: f32[8,1], index: 6, kind: input, shape index: {}]   ;;  %s815_s3 = inlined_call_operand.vmem [shape: f32[16,32], index: 3, kind: input, shape index: {}]   ;;  %s816_s5 = inlined_call_operand.vmem [shape: f32[8,16], index: 5, kind: input, shape index: {}]   ;;  %s817_s8 = inlined_call_operand.vmem [shape: f32[1,8], index: 8, kind: input, shape index: {}]   ;;  %s818_s7 = inlined_call_operand.vmem [shape: f32[1,8], index: 7, kind: input, shape index: {}]   ;;  %s819_s10 = inlined_call_operand.vmem [shape: f32[1,128], index: 10, kind: output, shape index: {}]  }
   0x1   :  { %v572_v0 = vld [vmem:[%s809_s0 + $0x20] sm:$0xff]   ;;  %v571_v1 = vld [vmem:[%s809_s0 + $0x18] sm:$0xff]   ;;  %657 = vset.pattern.permute.xlu0 %v663_v2  ;;  %658 = vset.pattern.permute.xlu1 %v663_v2  ;;  %v15_v3 = vstv %s811_s9  ;;  %v62_v9 = vld [vmem:[%s812_s2 + $0x8] sm:$0xff]  ;;  %vm665_vm2 = vmmov 0   ;;  %vm292_vm3 = vcmask 130048   ;;  %vm370_vm4 = vcmask 64512  }
   0x2   :  { %v567_v4 = vunpack.c.l.bf16 %v572_v0  ;;  %v568_v5 = vunpack.c.h.bf16 %v572_v0  ;;  %v57_v6 = vld [vmem:[%s810_s1] sm:$0xff]  ;;  %16 = vst [vmem:[#allocation2] sm:$0x1] %v15_v3  ;;  %v564_v7 = vunpack.c.h.bf16 %v571_v1  ;;  %v64_v8 = vld [vmem:[%s812_s2 + $0x18] sm:$0xff]  ;;  %v570_v10 = vld [vmem:[%s809_s0 + $0x10] sm:$0xff]   ;;  %v563_v11 = vunpack.c.l.bf16 %v571_v1  ;;  %72 = vperm.xlu1 %658, %v62_v9  }
   0x3   :  { %620 = vmatprep.mubr.msk.f32.mxu0 %vm85_vm0, %v57_v6  ;;  %82 = vperm.xlu0 %657, %v64_v8   ;;  %v63_v12 = vld [vmem:[%s812_s2 + $0x10] sm:$0xff]  ;;  %v61_v13 = vld [vmem:[%s812_s2] sm:$0xff]  ;;  %v749_v14 = vunpack.c.h.bf16 %v570_v10  ;;  %v569_v15 = vld [vmem:[%s809_s0 + $0x8] sm:$0xff]   ;;  %v559_v16 = vunpack.c.l.bf16 %v570_v10  ;;  %v523_v1 = vlaneseq }
   0x4   :  { %600 = vmatprep.subr.mxu0 %v568_v5  ;;  %v190_v17 = vld [vmem:[%s813_s4 + $0x8] sm:$0xff]  ;;  %v189_v18 = vld [vmem:[%s813_s4] sm:$0xff]  ;;  %v556_v19 = vunpack.c.h.bf16 %v569_v15  ;;  %v555_v21 = vunpack.c.l.bf16 %v569_v15  ;;  %v59_v27 = vld [vmem:[%s810_s1 + $0x10] sm:$0xff] }
   0x5   :  { %601 = vmatpush3.msra.mxu0 %v568_v5  ;;  %v550_v20 = vld [vmem:[%s809_s0] sm:$0xff]   ;;  %v58_v26 = vld [vmem:[%s810_s1 + $0x8] sm:$0xff]  ;;  %v60_v28 = vld [vmem:[%s810_s1 + $0x18] sm:$0xff]  ;;  %v524_v2 = vshrl.u32 %v523_v1, 7 }
   0x6   :  { %602 = vmatprep.subr.mxu0 %v567_v4  ;;  %67 = vperm.xlu1 %658, %v61_v13   ;;  %v286_v22 = vld [vmem:[%s814_s6] sm:$0xff]  ;;  %v552_v24 = vunpack.c.h.bf16 %v550_v20  ;;  %v768_v25 = vunpack.c.l.bf16 %v550_v20  ;;  %v188_v46 = vld [vmem:[%s815_s3 + $0x8] sm:$0xff] }
   0x7   :  { %603 = vmatpush3.msra.mxu0 %v567_v4  ;;  %77 = vperm.xlu0 %657, %v63_v12   ;;  %v187_v29 = vld [vmem:[%s815_s3] sm:$0xff]  ;;  %v525_v4 = vsub.s32 0, %v524_v2 }
   0x8   :  { %604 = vmatprep.subr.mxu0 %v564_v7  ;;  %634 = vmatprep.mubr.msk.f32.mxu1 %vm201_vm1, %v187_v29  ;;  %v285_v56 = vld [vmem:[%s816_s5] sm:$0xff]  ;;  %v367_v63 = vmul.f32 %v749_v14, %v768_v25 }
   0x9   :  { %605 = vmatpush3.msra.mxu0 %v564_v7  ;;  %v517_v23 = vld [vmem:[#allocation2] sm:$0x1] }
   0xa   :  { %606 = vmatprep.subr.mxu0 %v563_v11  ;;  %193 = vperm.xlu1 %658, %v189_v18   ;;  %v369_v62 = vld [vmem:[%s817_s8] sm:$0x1] }
   0xb   :  { %607 = vmatpush3.msra.mxu0 %v563_v11  ;;  %198 = vperm.xlu0 %657, %v190_v17   ;;  %v368_v0 = vld [vmem:[%s818_s7] sm:$0x1] }
   0xc   :  { %608 = vmatprep.subr.mxu0 %v749_v14 }
   0xd   :  { %609 = vmatpush3.msra.mxu0 %v749_v14 }
   0xe   :  { %610 = vmatprep.subr.mxu0 %v559_v16  ;;  %520 = vperm.xlu1 %658, %v517_v23  }
   0xf   :  { %611 = vmatpush3.msra.mxu0 %v559_v16  ;;  %289 = vperm.xlu0 %657, %v286_v22  }
  0x10   :  { %612 = vmatprep.subr.mxu0 %v556_v19 }
  0x11   :  { %613 = vmatpush3.msra.mxu0 %v556_v19 }
  0x12   :  { %614 = vmatprep.subr.mxu0 %v555_v21 }
  0x13   :  { %615 = vmatpush3.msra.mxu0 %v555_v21 }
  0x14   :  { %616 = vmatprep.subr.mxu0 %v552_v24 }
  0x15   :  { %617 = vmatpush3.msra.mxu0 %v552_v24 }
  0x16   :  { %618 = vmatprep.subr.mxu0 %v768_v25 }
  0x17   :  { %619 = vmatpush3.msra.mxu0 %v768_v25 }
  0x18   :  { %621 = vmatmul.mubr.msk.f32.vlgmr.msra.gmra.mxu0 %vm85_vm0, %v58_v26 }
  0x19   :  { %623 = vmatprep.mubr.msk.f32.mxu0 %vm85_vm0, %v59_v27 }
  0x1c   :  { %624 = vmatmul.mubr.msk.f32.gmra.mxu0 %vm85_vm0, %v60_v28 }
  0x7d   :  { %v73_v32 = vpop.permute.xlu1 %72 }
  0x7e   :  { %v83_v30 = vpop.permute.xlu0 %82 }
  0x81   :  { %v68_v41 = vpop.permute.xlu1 %67 }
  0x82   :  { %v78_v36 = vpop.permute.xlu0 %77 }
  0x85   :  { %v194_v51 = vpop.permute.xlu1 %193 }
  0x86   :  { %v199_v48 = vpop.permute.xlu0 %198 }
  0x89   :  { %v521_v5 = vpop.permute.xlu1 %520 }
  0x8a   :  { %v290_v57 = vpop.permute.xlu0 %289  ;;  %v526_v8 = vrot.slane %v521_v5, %v525_v4 }
  0xd8   :  { %v622_v31 = vpop.f32.mrf.mxu0 }
  0xd9   :  { %v170_v38 = vadd.f32 %v622_v31, %v73_v32 }
  0xda   :  { %v164_v33 = vpop.f32.mrf.mxu0 }
  0xdb   :  { %v165_v42 = vadd.f32 %v164_v33, %v68_v41  ;;  %v184_v44 = vmax.f32 %v170_v38, 0.0 }
  0xdc   :  { %v625_v34 = vpop.f32.mrf.mxu0 }
  0xdd   :  { %v180_v35 = vadd.f32 %v625_v34, %v83_v30  ;;  %v183_v45 = vmax.f32 %v165_v42, 0.0 }
  0xde   :  { %v174_v37 = vpop.f32.mrf.mxu0 }
  0xdf   :  { %v186_v39 = vmax.f32 %v180_v35, 0.0  ;;  %v175_v40 = vadd.f32 %v174_v37, %v78_v36 }
  0xe1   :  { %v185_v43 = vmax.f32 %v175_v40, 0.0  ;;  %626 = vmatprep.subr.mxu1 %v186_v39 }
  0xe2   :  { %627 = vmatpush3.msra.mxu1 %v186_v39 }
  0xe3   :  { %628 = vmatprep.subr.mxu1 %v185_v43 }
  0xe4   :  { %629 = vmatpush3.msra.mxu1 %v185_v43 }
  0xe5   :  { %630 = vmatprep.subr.mxu1 %v184_v44 }
  0xe6   :  { %631 = vmatpush3.msra.mxu1 %v184_v44 }
  0xe7   :  { %632 = vmatprep.subr.mxu1 %v183_v45 }
  0xe8   :  { %633 = vmatpush3.msra.mxu1 %v183_v45 }
  0xe9   :  { %635 = vmatmul.mubr.msk.f32.vlgmr.msra.gmra.mxu1 %vm201_vm1, %v188_v46  ;;  %637 = vmatprep.subr.mxu1 %v664_v47 }
  0xea   :  { %641 = vmatprep.mubr.msk.f32.mxu1 %vm665_vm2, %v664_v47 }
 0x1a9   :  { %v636_v49 = vpop.f32.mrf.mxu1 }
 0x1aa   :  { %v280_v50 = vadd.f32 %v636_v49, %v199_v48 }
 0x1ab   :  { %v274_v52 = vpop.f32.mrf.mxu1 }
 0x1ac   :  { %v284_v53 = vmax.f32 %v280_v50, 0.0  ;;  %v275_v54 = vadd.f32 %v274_v52, %v194_v51 }
 0x1ae   :  { %v283_v55 = vmax.f32 %v275_v54, 0.0  ;;  %638 = vmatpush3.msra.mxu1 %v284_v53 }
 0x1af   :  { %639 = vmatprep.subr.mxu1 %v664_v47 }
 0x1b0   :  { %640 = vmatpush3.msra.mxu1 %v283_v55 }
 0x1b1   :  { %642 = vmatmul.mubr.msk.f32.vlgmr.msra.gmra.mxu1 %vm292_vm3, %v285_v56  ;;  %644 = vmatprep.subr.mxu1 %v664_v47 }
 0x1b2   :  { %646 = vmatprep.mubr.msk.f32.mxu1 %vm665_vm2, %v664_v47 }
 0x271   :  { %v362_v58 = vpop.f32.mrf.mxu1 }
 0x272   :  { %v363_v59 = vadd.f32 %v362_v58, %v290_v57 }
 0x273   :  { %v643_v60 = vpop.f32.mrf.mxu1 }
 0x274   :  { %v366_v61 = vmax.f32 %v363_v59, 0.0 }
 0x276   :  { %645 = vmatpush3.msra.mxu1 %v366_v61 }
 0x277   :  { %647 = vmatmul.mubr.msk.f32.vlgmr.msra.gmra.mxu1 %vm370_vm4, %v369_v62  ;;  %649 = vmatprep.subr.mxu1 %v664_v47 }
 0x278   :  { %650 = vmatpush3.msra.mxu1 %v367_v63  ;;  %651 = vmatprep.mubr.msk.f32.mxu1 %vm665_vm2, %v664_v47 }
 0x27b   :  { %652 = vmatmul.mubr.msk.f32.vlgmr.msra.gmra.mxu1 %vm370_vm4, %v368_v0 }
 0x337   :  { %v440_v3 = vpop.f32.mrf.mxu1 }
 0x339   :  { %v648_v6 = vpop.f32.mrf.mxu1 }
 0x33b   :  { %v513_v7 = vpop.f32.mrf.mxu1 }
 0x33c   :  { %v514_v9 = vadd.f32 %v513_v7, %v440_v3 }
 0x33d   :  { %v653_v10 = vpop.f32.mrf.mxu1 }
 0x33e   :  { %v527_v11 = vadd.f32 %v526_v8, %v514_v9 }
 0x340   :  { %v548_v12 = vmul.f32 -1.442695, %v527_v11 }
 0x342   :  { %659 = vpow2.f32 %v548_v12 }
 0x34f   :  { %v660_v13 = vpop.eup %659 }
 0x350   :  { %v531_v14 = vadd.f32 1.0, %v660_v13 }
 0x352   :  { %661 = vrcp.f32 %v531_v14 }
 0x35f   :  { %v662_v15 = vpop.eup %661 }
 0x360   :  { %534 = vst [vmem:[%s819_s10] sm:$0x1] %v662_v15 }

</bundles_post_ra>
